<compile_context>
chip_gen: v7x
topology: tpu7x:2x2x1
jax: 0.10.0
libtpu: 0.0.40
codegen_flags: <defaults>
</compile_context>

<pallas_src>
import functools

import jax
import jax.numpy as jnp
import numpy as np
from jax.experimental import pallas as pl
from jax.experimental.pallas import tpu as pltpu


def _simam_kernel(x_ref, o_ref, *, hw, e_lambda):
    # x_ref / o_ref: (row_block, H*W) -- each row is one (batch, channel) plane.
    x = x_ref[...].astype(jnp.float32)

    inv_hw = 1.0 / float(hw)
    # Guard the degenerate 1x1 spatial case (PyTorch would divide by n == 0).
    inv_n = 1.0 / float(max(hw - 1, 1))

    # Two independent cross-lane (XLU) reductions in one pass over x.
    sx = jnp.sum(x, axis=-1, keepdims=True)          # (rows, 1)
    sxx = jnp.sum(x * x, axis=-1, keepdims=True)     # (rows, 1)

    mean = sx * inv_hw
    # sum((x - mean)^2) = sum(x^2) - hw * mean^2 ; clamp tiny negative from
    # cancellation on near-constant planes.
    s = jnp.maximum(sxx - float(hw) * mean * mean, 0.0)

    denom = 4.0 * (s * inv_n + e_lambda)             # (rows, 1), > 0
    inv_denom = pl.reciprocal(denom, approx=False)   # one per row, not per elem

    d = x - mean
    y = d * d * inv_denom + 0.5
    att = jax.nn.sigmoid(y)                          # EUP exp

    o_ref[...] = (x * att).astype(o_ref.dtype)


def _sublane_multiple(dtype):
    itemsize = jnp.dtype(dtype).itemsize
    return {4: 8, 2: 16, 1: 32}.get(itemsize, 8)


def _pick_row_block(rows, hw, dtype):
    """VMEM- and megacore-aware row-tile size.

    Targets <= ~4 MiB per block (=> <= ~16 MiB resident with double-buffered
    in + out buffers), fits the default scoped VMEM on v5e/v6e/v7x and v7x's
    64 MiB physical VMEM, and keeps >= 2 grid steps whenever rows permit so
    the DMA pipeline overlaps and the 'parallel' axis shards across v7x's two
    TensorCores.
    """
    itemsize = jnp.dtype(dtype).itemsize
    sub = _sublane_multiple(dtype)
    if rows <= sub:
        return rows                                   # full extent: always legal

    budget_bytes = 4 * 1024 * 1024                    # per-block budget (~4x resident)
    by_vmem = max(sub, (budget_bytes // max(hw * itemsize, 1)) // sub * sub)
    by_grid = max(sub, (rows // 2) // sub * sub)      # prefer >= 2 grid steps
    rb = min(by_vmem, by_grid, 1024)
    if rb >= rows:
        return rows
    return rb


def simam(x_nchw, e_lambda=1e-4):
    """SimAM attention forward: x * sigmoid(y) with per-(b, c) spatial stats."""
    N, C, H, W = x_nchw.shape
    BC, HW = N * C, H * W
    itemsize = jnp.dtype(x_nchw.dtype).itemsize

    # Free view for contiguous NCHW: no transpose, no extra HBM traffic.
    x2 = x_nchw.reshape(BC, HW)

    row_block = _pick_row_block(BC, HW, x_nchw.dtype)
    grid = (pl.cdiv(BC, row_block),)

    block_bytes = row_block * HW * itemsize
    # ~2x double-buffered (in + out) + headroom; capped at v7x physical VMEM.
    vmem_limit = int(min(64 * 1024 * 1024,
                         max(16 * 1024 * 1024, 5 * block_bytes + (4 << 20))))

    kernel = functools.partial(_simam_kernel, hw=HW, e_lambda=float(e_lambda))

    cost = pl.CostEstimate(
        flops=10 * BC * HW,
        transcendentals=BC * HW,
        bytes_accessed=2 * BC * HW * itemsize,
    )

    out2 = pl.pallas_call(
        kernel,
        out_shape=jax.ShapeDtypeStruct((BC, HW), x_nchw.dtype),
        grid_spec=pltpu.PrefetchScalarGridSpec(
            num_scalar_prefetch=0,
            grid=grid,
            in_specs=[pl.BlockSpec((row_block, HW), lambda i: (i, 0))],
            out_specs=pl.BlockSpec((row_block, HW), lambda i: (i, 0)),
        ),
        compiler_params=pltpu.CompilerParams(
            dimension_semantics=("parallel",),
            vmem_limit_bytes=vmem_limit,
        ),
        cost_estimate=cost,
    )(x2)

    return out2.reshape(N, C, H, W)


def _reference(x, e_lambda):
    _, _, H, W = x.shape
    n = max(H * W - 1, 1)
    mu = jnp.mean(x, axis=(2, 3), keepdims=True)
    sq = (x - mu) ** 2
    y = sq / (4.0 * (jnp.sum(sq, axis=(2, 3), keepdims=True) / n + e_lambda)) + 0.5
    return x * jax.nn.sigmoid(y)


if __name__ == "__main__":
    e_lambda = 1e-4
    key = jax.random.PRNGKey(0)

    # Case 1: shapes implied by simam_module usage -- small NCHW feature map.
    k1, k2 = jax.random.split(key)
    x1 = jax.random.normal(k1, (2, 4, 16, 16), dtype=jnp.float32)
    y1 = jax.block_until_ready(simam(x1, e_lambda=e_lambda))
    ref1 = _reference(x1, e_lambda)
    np.testing.assert_allclose(np.asarray(y1), np.asarray(ref1),
                               rtol=1e-5, atol=1e-5)

    # Case 2: N*C not a multiple of the row tile -> exercises the cdiv grid
    # (ragged last block, clipped store).
    x2 = jax.random.normal(k2, (5, 4, 16, 16), dtype=jnp.float32)
    y2 = jax.block_until_ready(simam(x2, e_lambda=e_lambda))
    ref2 = _reference(x2, e_lambda)
    np.testing.assert_allclose(np.asarray(y2), np.asarray(ref2),
                               rtol=1e-5, atol=1e-5)

    print("KERNEL_OK")
</pallas_src>

<mosaic_0001>
module attributes {stable_mosaic.version = 11 : i64} {
  func.func @_simam_kernel(%arg0: i32, %arg1: memref<8x256xf32, #tpu.memory_space<vmem>>, %arg2: memref<8x256xf32, #tpu.memory_space<vmem>>) attributes {dimension_semantics = [#tpu.dimension_semantics<parallel>], iteration_bounds = array<i64: 1>, scalar_prefetch = 0 : i64, scratch_operands = 0 : i64, tpu.core_type = #tpu.core_type<tc>, window_params = [{transform_indices = @transform_0, window_bounds = array<i64: 8, 256>}, {transform_indices = @transform_1, window_bounds = array<i64: 8, 256>}]} {
    %c0 = arith.constant 0 : index
    %c0_0 = arith.constant 0 : index
    %0 = vector.load %arg1[%c0, %c0_0] : memref<8x256xf32, #tpu.memory_space<vmem>>, vector<8x256xf32>
    %cst = arith.constant dense<0.000000e+00> : vector<8xf32>
    %1 = vector.multi_reduction <add>, %0, %cst [1] : vector<8x256xf32> to vector<8xf32>
    %2 = vector.shape_cast %1 : vector<8xf32> to vector<8x1xf32>
    %3 = arith.mulf %0, %0 : vector<8x256xf32>
    %cst_1 = arith.constant dense<0.000000e+00> : vector<8xf32>
    %4 = vector.multi_reduction <add>, %3, %cst_1 [1] : vector<8x256xf32> to vector<8xf32>
    %5 = vector.shape_cast %4 : vector<8xf32> to vector<8x1xf32>
    %cst_2 = arith.constant 3.906250e-03 : f32
    %6 = vector.broadcast %cst_2 : f32 to vector<8x1xf32>
    %7 = arith.mulf %2, %6 : vector<8x1xf32>
    %cst_3 = arith.constant 2.560000e+02 : f32
    %8 = vector.broadcast %cst_3 : f32 to vector<8x1xf32>
    %9 = arith.mulf %8, %7 : vector<8x1xf32>
    %10 = arith.mulf %9, %7 : vector<8x1xf32>
    %11 = arith.subf %5, %10 : vector<8x1xf32>
    %cst_4 = arith.constant 0.000000e+00 : f32
    %12 = vector.broadcast %cst_4 : f32 to vector<8x1xf32>
    %13 = arith.maximumf %11, %12 : vector<8x1xf32>
    %cst_5 = arith.constant 0.00392156886 : f32
    %14 = vector.broadcast %cst_5 : f32 to vector<8x1xf32>
    %15 = arith.mulf %13, %14 : vector<8x1xf32>
    %cst_6 = arith.constant 9.99999974E-5 : f32
    %16 = vector.broadcast %cst_6 : f32 to vector<8x1xf32>
    %17 = arith.addf %15, %16 : vector<8x1xf32>
    %cst_7 = arith.constant 4.000000e+00 : f32
    %18 = vector.broadcast %cst_7 : f32 to vector<8x1xf32>
    %19 = arith.mulf %18, %17 : vector<8x1xf32>
    %20 = tpu.reciprocal %19 : vector<8x1xf32> -> vector<8x1xf32>
    %21 = vector.broadcast %7 : vector<8x1xf32> to vector<8x256xf32>
    %22 = arith.subf %0, %21 : vector<8x256xf32>
    %23 = arith.mulf %22, %22 : vector<8x256xf32>
    %24 = vector.broadcast %20 : vector<8x1xf32> to vector<8x256xf32>
    %25 = arith.mulf %23, %24 : vector<8x256xf32>
    %cst_8 = arith.constant 5.000000e-01 : f32
    %26 = vector.broadcast %cst_8 : f32 to vector<8x256xf32>
    %27 = arith.addf %25, %26 : vector<8x256xf32>
    %28 = arith.negf %27 : vector<8x256xf32>
    %29 = math.exp %28 : vector<8x256xf32>
    %cst_9 = arith.constant 1.000000e+00 : f32
    %30 = vector.broadcast %cst_9 : f32 to vector<8x256xf32>
    %31 = arith.addf %30, %29 : vector<8x256xf32>
    %32 = arith.divf %30, %31 : vector<8x256xf32>
    %33 = arith.mulf %0, %32 : vector<8x256xf32>
    %c0_10 = arith.constant 0 : index
    %c0_11 = arith.constant 0 : index
    %34 = vector.load %arg2[%c0_10, %c0_11] : memref<8x256xf32, #tpu.memory_space<vmem>>, vector<8x256xf32>
    tpu.vector_store %arg2[%c0_10, %c0_11], %33 {strides = array<i32>} : memref<8x256xf32, #tpu.memory_space<vmem>>, vector<8x256xf32>,
    return
  }
  func.func @transform_0(%arg0: i32) -> (i32, i32) {
    %c0_i32 = arith.constant 0 : i32
    %c0_i32_0 = arith.constant 0 : i32
    return %arg0, %c0_i32 : i32, i32
  }
  func.func @transform_1(%arg0: i32) -> (i32, i32) {
    %c0_i32 = arith.constant 0 : i32
    %c0_i32_0 = arith.constant 0 : i32
    return %arg0, %c0_i32 : i32, i32
  }
}

</mosaic_0001>

<bundles_post_ra>
// kernel: tpu_custom_call.1
= control target key start
LH: loop header
LB: loop body
LE: loop exit
PB: predicated region body
PF: predicated region fallthrough
CT: control target
= control target key end

     0   :  { %6 = vsyncpa [#allocation3], 0  ;;  %s177_s0 = inlined_call_operand.hbm [shape: f32[8,256], index: 0, kind: input, shape index: {}]   ;;  %s178_s1 = inlined_call_operand.hbm [shape: f32[8,256], index: 1, kind: output, shape index: {}]  }
   0x1   :  { %7 = vsyncpa [#allocation4], 0  ;;  %s141_s6 = smov [#allocation2]   ;;  %s93_s10 = scalar_lea.hbm %s177_s0, 256 }
   0x2   :  { %s14_s7 = sshll.u32 %s141_s6, 4  ;;  %p94_p0 = scmp.ne.s32.totalorder %s177_s0, %s93_s10  ;;  %s15_s7 = int_to_ptr.vmem [resolvable:$true] %s14_s7 }
   0x3   :  { %p97_p1 = scmp.lt.u32.totalorder %s93_s10, %s177_s0 }
   0x5   :  { %p99_p2 = pnand %p97_p1, %p94_p0 }
   0x7   :  { %102 = shalt.err (!%p99_p2)
}
   0x8   :  { %s103_s15 = scalar_lea.vmem %s15_s7, 256  ;;  %p108_p4 = scmp.lt.s32.totalorder %s15_s7, %s15_s7 }
   0x9   :  { %p104_p3 = scmp.ne.s32.totalorder %s15_s7, %s103_s15  ;;  %p109_p5 = scmp.lt.s32.totalorder %s103_s15, %s103_s15 }
   0xb   :  { %p110_p6 = por %p109_p5, %p108_p4 }
   0xd   :  { %p111_p7 = pnand %p110_p6, %p104_p3 }
   0xf   :  { %114 = shalt.err (!%p111_p7)
}
  0x10   :  { %17 = dma.hbm_to_vmem [thread:$0]  %s177_s0, 256, %s15_s7, [#allocation3]  }
  0x11   :  { %137 = dma.done.wait [#allocation3], 256  }
  0x12   :  { %138 = vsyncadd [#allocation3], 4294967040  ;;  %v21_v0 = vld [vmem:[#allocation2] sm:$0xff]  ;;  %v22_v1 = vld [vmem:[#allocation2 + $0x8] sm:$0xff]  ;;  %s142_s0 = smov [#allocation5]  }
  0x13   :  { %v23_v2 = vadd.f32 %v22_v1, %v21_v0  ;;  %v26_v3 = vmul.f32 %v21_v0, %v21_v0  ;;  %v27_v4 = vmul.f32 %v22_v1, %v22_v1  ;;  %s70_s18 = sshll.u32 %s142_s0, 4  ;;  %s71_s18 = int_to_ptr.vmem [resolvable:$true] %s70_s18 }
  0x14   :  { %s115_s19 = scalar_lea.vmem %s71_s18, 256  ;;  %p120_p9 = scmp.lt.s32.totalorder %s71_s18, %s71_s18 }
  0x15   :  { %24 = vadd.xlane.f32.xlu0 %v23_v2  ;;  %v28_v5 = vadd.f32 %v27_v4, %v26_v3  ;;  %p116_p8 = scmp.ne.s32.totalorder %s71_s18, %s115_s19  ;;  %p121_p10 = scmp.lt.s32.totalorder %s115_s19, %s115_s19 }
  0x17   :  { %p122_p11 = por %p121_p10, %p120_p9 }
  0x19   :  { %29 = vadd.xlane.f32.xlu0 %v28_v5  ;;  %p123_p12 = pnand %p122_p11, %p116_p8 }
  0xa2   :  { %v25_v6 = vpop.xlane.xlu0 %24 }
  0xa3   :  { %v31_v7 = vmul.f32 0.00390625, %v25_v6 }
  0xa5   :  { %v32_v8 = vmul.f32 256.0, %v31_v7  ;;  %v40_v16 = vsub.f32 %v21_v0, %v31_v7  ;;  %v41_v17 = vsub.f32 %v22_v1, %v31_v7 }
  0xa6   :  { %v30_v9 = vpop.xlane.xlu0 %29 }
  0xa7   :  { %v33_v10 = vmul.f32 %v32_v8, %v31_v7  ;;  %v42_v18 = vmul.f32 %v40_v16, %v40_v16  ;;  %v43_v19 = vmul.f32 %v41_v17, %v41_v17 }
  0xa9   :  { %v34_v11 = vsub.f32 %v30_v9, %v33_v10 }
  0xab   :  { %v35_v12 = vmax.f32 %v34_v11, 0.0 }
  0xad   :  { %v36_v13 = vmul.f32 0.003921569, %v35_v12 }
  0xaf   :  { %v37_v14 = vadd.f32 0.0001, %v36_v13 }
  0xb1   :  { %v38_v15 = vmul.f32 4.0, %v37_v14 }
  0xb3   :  { %83 = vrcp.f32 %v38_v15 }
  0xbd   :  { %v84_v20 = vpop.eup %83 }
  0xbe   :  { %v44_v21 = vmul.f32 %v84_v20, %v42_v18  ;;  %v45_v22 = vmul.f32 %v84_v20, %v43_v19 }
  0xc0   :  { %v46_v23 = vadd.f32 0.5, %v44_v21  ;;  %v47_v24 = vadd.f32 0.5, %v45_v22 }
  0xc2   :  { %v79_v25 = vmul.f32 -1.442695, %v46_v23  ;;  %v80_v26 = vmul.f32 -1.442695, %v47_v24 }
  0xc4   :  { %85 = vpow2.f32 %v79_v25 }
  0xc5   :  { %87 = vpow2.f32 %v80_v26 }
  0xce   :  { %v86_v27 = vpop.eup %85 }
  0xcf   :  { %v88_v28 = vpop.eup %87  ;;  %v54_v29 = vadd.f32 1.0, %v86_v27 }
  0xd0   :  { %v55_v30 = vadd.f32 1.0, %v88_v28 }
  0xd1   :  { %89 = vrcp.f32 %v54_v29 }
  0xd2   :  { %91 = vrcp.f32 %v55_v30 }
  0xdb   :  { %v90_v31 = vpop.eup %89 }
  0xdc   :  { %v92_v32 = vpop.eup %91  ;;  %v60_v33 = vmul.f32 %v90_v31, %v21_v0 }
  0xdd   :  { %v61_v34 = vmul.f32 %v92_v32, %v22_v1 }
  0xde   :  { %62 = vst [vmem:[#allocation5] sm:$0xff] %v60_v33 }
  0xdf   :  { %63 = vst [vmem:[#allocation5 + $0x8] sm:$0xff] %v61_v34 }
  0xe0   :  { %126 = shalt.err (!%p123_p12)
}
  0xe1   :  { %s127_s22 = scalar_lea.hbm %s178_s1, 256 }
  0xe2   :  { %p128_p13 = scmp.ne.s32.totalorder %s178_s1, %s127_s22  ;;  %p131_p0 = scmp.lt.u32.totalorder %s127_s22, %s178_s1 }
  0xe4   :  { %p133_p1 = pnand %p131_p0, %p128_p13 }
  0xe6   :  { %136 = shalt.err (!%p133_p1)
}
  0xe7   :  { %73 = dma.vmem_to_hbm [thread:$0]  %s71_s18, 256, %s178_s1, [#allocation4]  }
  0xe8   :  { %139 = dma.done.wait [#allocation4], 256  }
  0xe9   :  { %140 = vsyncadd [#allocation4], 4294967040 }
  0xea   :  { %77 = vsyncpa [#allocation3], 1 }
  0xeb   :  { %78 = vsyncpa [#allocation4], 1 }

</bundles_post_ra>
